<compile_context>
chip_gen: v5e
topology: v5e:2x2
jax: 0.10.0
libtpu: 0.0.40
codegen_flags: <defaults>
</compile_context>

<pallas_src>
import functools

import jax
import jax.numpy as jnp
from jax.experimental import pallas as pl
from jax.experimental.pallas import tpu as pltpu

LANE = 128  # pad the task dimension to one full vreg lane row


def _awl_kernel(packed_ref, out_ref, *, num):
    # packed_ref: (2, LANE) f32; row 0 = params (zero-padded), row 1 = losses.
    p = packed_ref[0:1, :]          # (1, LANE)
    l = packed_ref[1:2, :]          # (1, LANE)

    # In-kernel validity mask over the lane dim; `num` is a static Python int.
    lane_idx = jax.lax.broadcasted_iota(jnp.int32, (1, LANE), 1)
    valid = lane_idx < num          # (1, LANE) bool

    p2 = p * p
    # Keep padded lanes finite (padded params are 0 -> 1/p2 would be inf).
    p2_safe = jnp.where(valid, p2, 1.0)

    term = 0.5 * l * pl.reciprocal(p2_safe) + jnp.log1p(p2_safe)
    term = jnp.where(valid, term, 0.0)   # select (not multiply) kills pad lanes

    out_ref[...] = jnp.sum(term, keepdims=True)  # (1, 1)


def automatic_weighted_loss(params, losses):
    """params: (num,) f32 learnable weights; losses: (num,) f32 scalar losses."""
    num = params.shape[0]
    assert losses.shape[0] == num
    assert num <= LANE

    # Single packed input: (2, num) -> zero-pad once to (2, LANE).
    packed = jnp.stack(
        [params.astype(jnp.float32), losses.astype(jnp.float32)], axis=0)
    packed = jnp.pad(packed, ((0, 0), (0, LANE - num)))

    out = pl.pallas_call(
        functools.partial(_awl_kernel, num=num),
        out_shape=jax.ShapeDtypeStruct((1, 1), jnp.float32),
        in_specs=[pl.BlockSpec(memory_space=pltpu.VMEM)],
        out_specs=pl.BlockSpec(memory_space=pltpu.VMEM),
    )(packed)
    return out[0, 0]


if __name__ == "__main__":
    num = 2
    key = jax.random.PRNGKey(0)
    k_loss, k_param = jax.random.split(key)

    # Case 1: parameters exactly as initialized by the module (torch.ones(num)).
    params = jnp.ones((num,), jnp.float32)
    losses = jax.random.uniform(k_loss, (num,), jnp.float32, minval=0.5, maxval=2.0)

    result = automatic_weighted_loss(params, losses)
    jax.block_until_ready(result)
    ref = jnp.sum(0.5 / params**2 * losses + jnp.log1p(params**2))
    assert jnp.allclose(result, ref, rtol=1e-6, atol=1e-6), (result, ref)

    # Case 2: non-trivial params (as if after some training steps).
    params2 = jax.random.uniform(k_param, (num,), jnp.float32, minval=0.5, maxval=1.5)
    result2 = automatic_weighted_loss(params2, losses)
    jax.block_until_ready(result2)
    ref2 = jnp.sum(0.5 / params2**2 * losses + jnp.log1p(params2**2))
    assert jnp.allclose(result2, ref2, rtol=1e-6, atol=1e-6), (result2, ref2)

    print("KERNEL_OK")
</pallas_src>

<mosaic_0001>
module attributes {stable_mosaic.version = 11 : i64} {
  func.func @_awl_kernel(%arg0: memref<2x128xf32, #tpu.memory_space<vmem>>, %arg1: memref<1x1xf32, #tpu.memory_space<vmem>>) attributes {dimension_semantics = [], scalar_prefetch = 0 : i64, scratch_operands = 0 : i64, tpu.core_type = #tpu.core_type<tc>} {
    %c0 = arith.constant 0 : index
    %c0_0 = arith.constant 0 : index
    %0 = vector.load %arg0[%c0, %c0_0] : memref<2x128xf32, #tpu.memory_space<vmem>>, vector<1x128xf32>
    %c1 = arith.constant 1 : index
    %c0_1 = arith.constant 0 : index
    %1 = vector.load %arg0[%c1, %c0_1] : memref<2x128xf32, #tpu.memory_space<vmem>>, vector<1x128xf32>
    %2 = tpu.iota {dimensions = array<i32: 1>} : vector<1x128xi32>
    %c2_i32 = arith.constant 2 : i32
    %3 = vector.broadcast %c2_i32 : i32 to vector<1x128xi32>
    %4 = arith.cmpi slt, %2, %3 : vector<1x128xi32>
    %5 = arith.mulf %0, %0 : vector<1x128xf32>
    %cst = arith.constant 1.000000e+00 : f32
    %6 = vector.broadcast %cst : f32 to vector<1x128xf32>
    %7 = arith.select %4, %5, %6 : vector<1x128xi1>, vector<1x128xf32>
    %cst_2 = arith.constant 5.000000e-01 : f32
    %8 = vector.broadcast %cst_2 : f32 to vector<1x128xf32>
    %9 = arith.mulf %8, %1 : vector<1x128xf32>
    %10 = tpu.reciprocal %7 : vector<1x128xf32> -> vector<1x128xf32>
    %11 = arith.mulf %9, %10 : vector<1x128xf32>
    %12 = math.log1p %7 : vector<1x128xf32>
    %13 = arith.addf %11, %12 : vector<1x128xf32>
    %cst_3 = arith.constant 0.000000e+00 : f32
    %14 = vector.broadcast %cst_3 : f32 to vector<1x128xf32>
    %15 = arith.select %4, %13, %14 : vector<1x128xi1>, vector<1x128xf32>
    %16 = vector.shape_cast %15 : vector<1x128xf32> to vector<1x1x128xf32>
    %cst_4 = arith.constant dense<0.000000e+00> : vector<1xf32>
    %17 = vector.multi_reduction <add>, %16, %cst_4 [1, 2] : vector<1x1x128xf32> to vector<1xf32>
    %18 = vector.shape_cast %17 : vector<1xf32> to vector<1x1x1xf32>
    %19 = vector.extract %18[0, 0, 0] : f32 from vector<1x1x1xf32>
    %20 = vector.broadcast %19 : f32 to vector<1x1xf32>
    %c0_5 = arith.constant 0 : index
    %c0_6 = arith.constant 0 : index
    %21 = vector.load %arg1[%c0_5, %c0_6] : memref<1x1xf32, #tpu.memory_space<vmem>>, vector<1x1xf32>
    tpu.vector_store %arg1[%c0_5, %c0_6], %20 {strides = array<i32>} : memref<1x1xf32, #tpu.memory_space<vmem>>, vector<1x1xf32>,
    return
  }
}

</mosaic_0001>

<bundles_post_ra>
// kernel: tpu_custom_call.1
= control target key start
LH: loop header
LB: loop body
LE: loop exit
PB: predicated region body
PF: predicated region fallthrough
CT: control target
= control target key end

     0   :  { %6 = vsyncpa [#allocation3], 0  ;;  %s168_s0 = inlined_call_operand.hbm [shape: f32[2,128], index: 0, kind: input, shape index: {}]   ;;  %s169_s1 = inlined_call_operand.hbm [shape: f32[1,1], index: 1, kind: output, shape index: {}]  }
   0x1   :  { %7 = vsyncpa [#allocation4], 0  ;;  %s13_s8 = sshll.u32 %s168_s0, 4  ;;  %s148_s9 = smov [#allocation2]   ;;  %s14_s8 = int_to_ptr.hbm [resolvable:$true] %s13_s8 }
   0x2   :  { %s15_s10 = sshll.u32 %s148_s9, 4  ;;  %s16_s10 = int_to_ptr.vmem [resolvable:$true] %s15_s10 }
   0x3   :  { %18 = dma.hbm_to_vmem [thread:$0]  %s14_s8, 32, %s16_s10, [#allocation3]  }
   0x4   :  { %144 = dma.done.wait [#allocation3], 32  }
   0x5   :  { %145 = vsyncadd [#allocation3], 4294967264  ;;  %v25_v0 = vlaneseq  ;;  %v23_v2 = vld [vmem:[#allocation2] sm:$0x1]  ;;  %v24_v14 = vld [vmem:[#allocation2 + $0x1] sm:$0x1] }
   0x6   :  { %v28_v3 = vmul.f32 %v23_v2, %v23_v2  ;;  %v30_v19 = vmul.f32 0.5, %v24_v14  ;;  %vm57_vm6 = vcmask 1040384   ;;  %s149_s0 = smov [#allocation5]   ;;  %s78_s14 = sshll.u32 %s169_s1, 4  ;;  %vm69_vm7 = vcmask 0   ;;  %s79_s14 = int_to_ptr.hbm [resolvable:$true] %s78_s14 }
   0x7   :  { %v26_v1 = vand.u32 127, %v25_v0  ;;  %s76_s11 = sshll.u32 %s149_s0, 4  ;;  %s77_s11 = int_to_ptr.vmem [resolvable:$true] %s76_s11 }
   0x9   :  { %vm27_vm0 = vcmp.lt.s32.totalorder %v26_v1, 2 }
   0xa   :  { %v29_v4 = vsel %vm27_vm0, %v28_v3, 1.0 }
   0xb   :  { %92 = vrcp.f32 %v29_v4  ;;  %v46_v5 = vadd.f32 1.0, %v29_v4  ;;  %v49_v6 = vmul.f32 -0.5, %v29_v4  ;;  %v42_v9 = vand.u32 2147483648, %v29_v4 }
   0xc   :  { %vm36_vm1 = vweird.f32 %v29_v4  ;;  %v40_v13 = vand.u32 2147483647, %v29_v4 }
   0xd   :  { %94 = vlog2.f32 %v46_v5  ;;  %v50_v10 = vadd.f32 1.0, %v49_v6  ;;  %v43_v16 = vor.u32 1.1754944e-38, %v42_v9 }
   0xe   :  { %vm41_vm4 = vcmp.eq.f32.partialorder %v40_v13, 8.507059e+37  ;;  %vm53_vm5 = vcmp.lt.f32.partialorder %v40_v13, 0.0004427343 }
   0xf   :  { %v51_v18 = vmul.f32 %v50_v10, %v29_v4 }
  0x11   :  { %v93_v7 = vpop.eup %92 }
  0x12   :  { %v32_v8 = vmul.f32 %v93_v7, %v29_v4  ;;  %vm37_vm2 = vweird.f32 %v93_v7 }
  0x13   :  { %v95_v11 = vpop.eup %94  ;;  %vm38_vm3 = vmor %vm36_vm1, %vm37_vm2 }
  0x14   :  { %v33_v12 = vsub.f32 1.0, %v32_v8  ;;  %v48_v17 = vmul.f32 0.6931472, %v95_v11 }
  0x16   :  { %v34_v15 = vmul.f32 %v93_v7, %v33_v12  ;;  %v54_v23 = vsel %vm53_vm5, %v51_v18, %v48_v17 }
  0x18   :  { %v35_v20 = vadd.f32 %v93_v7, %v34_v15 }
  0x1a   :  { %v39_v21 = vsel %vm38_vm3, %v93_v7, %v35_v20 }
  0x1b   :  { %v44_v22 = vsel %vm41_vm4, %v43_v16, %v39_v21 }
  0x1c   :  { %v45_v24 = vmul.f32 %v44_v22, %v30_v19 }
  0x1e   :  { %v55_v25 = vadd.f32 %v54_v23, %v45_v24 }
  0x20   :  { %v56_v26 = vsel %vm27_vm0, %v55_v25, 0.0 }
  0x21   :  { %v58_v27 = vsel %vm57_vm6, %v56_v26, 0.0 }
  0x22   :  { %59 = vadd.xlane.f32.xlu0 %v58_v27 }
  0x95   :  { %v60_v28 = vpop.xlane.xlu0 %59 }
  0x96   :  { %v61_v29 = vrot.slane %v60_v28, 4 }
  0x98   :  { %v62_v30 = vadd.f32 %v61_v29, %v60_v28 }
  0x9a   :  { %v63_v31 = vrot.slane %v62_v30, 2 }
  0x9c   :  { %v64_v32 = vadd.f32 %v63_v31, %v62_v30 }
  0x9e   :  { %v65_v33 = vrot.slane %v64_v32, 1 }
  0xa0   :  { %v66_v34 = vadd.f32 %v65_v33, %v64_v32 }
  0xa2   :  { %88 = vpush %v66_v34 }
  0xd3   :  { %s89_s15 = spop %88 }
  0xd4   :  { %v68_v35 = vstv %s89_s15 }
  0xd5   :  { %70 = vst.msk [vmem:[#allocation5] sm:$0x1] %vm69_vm7, %v68_v35 }
  0xd6   :  { %81 = dma.vmem_to_hbm [thread:$0]  %s77_s11, 16, %s79_s14, [#allocation4]  }
  0xd7   :  { %146 = dma.done.wait [#allocation4], 16  }
  0xd8   :  { %147 = vsyncadd [#allocation4], 4294967280 }
  0xd9   :  { %86 = vsyncpa [#allocation3], 1 }
  0xda   :  { %87 = vsyncpa [#allocation4], 1 }

</bundles_post_ra>
